<compile_context>
chip_gen: v5e
topology: v5e:2x2
jax: 0.10.0
libtpu: 0.0.40
codegen_flags: <defaults>
</compile_context>

<pallas_src>
import math

import jax
import jax.numpy as jnp
import numpy as np
from jax.experimental import pallas as pl
from jax.experimental.pallas import tpu as pltpu

# ---- module hyperparameters (from the PyTorch script) ----
IN_CHANNELS = 1
PATCH_SIZE = 4
EMBED_DIM = PATCH_SIZE ** 2 * IN_CHANNELS          # 16
IMG_SIZE = 28
NUM_PATCHES = (IMG_SIZE // PATCH_SIZE) ** 2        # 49
DROPOUT_P = 0.001                                  # identity in eval mode


def _patch_embed_kernel(p_ref, w_ref, add_ref, out_ref):
    # p_ref:   (rows_packed, 128)  8 token rows (K=16 each) packed per 128-lane row
    # w_ref:   (128, 128)          block-diagonal weight (8 copies of the 16x16 W)
    # add_ref: (rows_packed, 128)  pos_emb with {cls_token | conv_bias} folded in
    # out_ref: (rows_packed, 128)
    proj = jnp.dot(p_ref[...], w_ref[...],
                   preferred_element_type=jnp.float32)          # full-width MXU matmul
    out_ref[...] = (proj + add_ref[...]).astype(out_ref.dtype)  # unmasked 128-lane store


def _plan_tiling(B, tokens, pack, target_rows=8192):
    """Choose (batch_tile, B_padded, grid_len).

    Lane packing folds `pack` consecutive token rows into one 128-lane row, so a
    tiled block needs (batch_tile*tokens/pack) % 8 == 0; with tokens=50, pack=8
    that means batch_tile % 32 == 0.  Tiny batches instead use one full-extent
    block (grid=1), which only needs (B*tokens) % pack == 0 (B % 4 == 0).
    `target_rows` caps token rows per grid step (~0.5 MB/block) so double-buffered
    blocks stay far inside the smallest scoped-VMEM budget (16 MiB on v5e) and
    v7x's 64 MiB physical VMEM, while keeping the pipeline busy.
    """
    sub_align = (8 * pack) // math.gcd(tokens, 8 * pack)    # 32 for T=50, pack=8
    m_align = pack // math.gcd(tokens, pack)                # 4
    if B < 2 * sub_align:
        b_pad = -(-B // m_align) * m_align                  # pad B to a multiple of 4
        return b_pad, b_pad, 1                              # single full-extent block
    max_bt = max(sub_align, (target_rows // tokens) // sub_align * sub_align)
    best = None
    for bt in range(sub_align, max_bt + 1, sub_align):
        grid = -(-B // bt)
        if grid < 2:                                        # keep >=2 steps for v7x's 2 TCs
            continue
        key = (grid * bt, -bt)                              # minimize padding, prefer big tiles
        if best is None or key < best[0]:
            best = (key, bt, grid)
    _, bt, grid = best
    return bt, bt * grid, grid


def _patch_embedding_impl(x_nchw, conv_w, conv_b, cls_token, pos_emb):
    """x_nchw: (B, C, H, W). Returns (B, N+1, E) float32."""
    B, C, H, W = x_nchw.shape
    P = PATCH_SIZE
    N = (H // P) * (W // P)
    T = N + 1                                                # tokens incl. cls
    K = C * P * P
    E = EMBED_DIM

    if cls_token.shape[1] != 1 or C != 1:
        # PyTorch module only composes correctly (cat + pos broadcast) for C == 1.
        raise ValueError("PatchEmbeding cls/pos layout requires in_channels == 1")
    if E != K or 128 % K != 0:
        raise ValueError("lane-packed kernel assumes E == K and K divides 128")

    pack = 128 // K                                          # 8 token rows per vreg row
    lane = K * pack                                          # 128
    batch_tile, B_pad, grid_len = _plan_tiling(B, T, pack)
    assert (batch_tile * T) % pack == 0 and (B_pad * T) % pack == 0
    rows_packed = batch_tile * T // pack

    # ---- patch extraction + zero cls row + lane pack (one fused pass under jit) ----
    x_f = x_nchw.astype(jnp.float32)
    if B_pad != B:
        x_f = jnp.pad(x_f, ((0, B_pad - B), (0, 0), (0, 0), (0, 0)))
    patches = x_f.reshape(B_pad, C, H // P, P, W // P, P)
    patches = patches.transpose(0, 2, 4, 1, 3, 5)            # (B, gh, gw, C, P, P)
    patches = patches.reshape(B_pad, N, K)
    tokens = jnp.pad(patches, ((0, 0), (1, 0), (0, 0)))      # zero cls row -> (B_pad, T, K)
    pflat_packed = tokens.reshape(B_pad * T // pack, lane)   # lane-packed, free reshape

    # conv weight (E, C, P, P) -> (K, E); block-diagonal (128, 128) so the packed
    # matmul applies W independently to each of the `pack` packed token rows.
    w2d = conv_w.reshape(E, K).T.astype(jnp.float32)         # (K, E)
    w_big = jnp.kron(jnp.eye(pack, dtype=jnp.float32), w2d)  # (128, 128), 64 KB

    # fold cls token (row 0) and conv bias (rows 1..N) into the positional add
    pos2d = pos_emb.reshape(T, E).astype(jnp.float32)
    cls_row = cls_token.reshape(1, E).astype(jnp.float32)
    bias_row = conv_b.reshape(1, E).astype(jnp.float32)
    additive = jnp.concatenate([pos2d[:1] + cls_row,
                                pos2d[1:] + bias_row], axis=0)        # (T, E)
    additive_packed = jnp.tile(additive, (batch_tile, 1)).reshape(rows_packed, lane)

    out_packed = pl.pallas_call(
        _patch_embed_kernel,
        out_shape=jax.ShapeDtypeStruct((B_pad * T // pack, lane), jnp.float32),
        grid=(grid_len,),
        in_specs=[
            # Streaming patch rows.  If profiling at very large B still shows
            # exposed input DMA, add pipeline_mode=pl.Buffered(3) on this spec only.
            pl.BlockSpec((rows_packed, lane), lambda i: (i, 0)),
            pl.BlockSpec((lane, lane), lambda i: (0, 0)),             # weight (shared)
            pl.BlockSpec((rows_packed, lane), lambda i: (0, 0)),      # folded pos/cls/bias
        ],
        out_specs=pl.BlockSpec((rows_packed, lane), lambda i: (i, 0)),
        compiler_params=pltpu.CompilerParams(
            dimension_semantics=("parallel",)),               # shards steps across v7x's 2 TCs
    )(pflat_packed, w_big, additive_packed)

    out = out_packed.reshape(B_pad, T, E)                     # free metadata reshape
    if B_pad != B:
        out = out[:B]
    return out


# jit the wrapper so the rearrangement/packing fuses into one HBM pass.
patch_embedding = jax.jit(_patch_embedding_impl)


def _reference(x_nchw, conv_w, conv_b, cls_token, pos_emb):
    """Pure-JAX reference using a real strided conv (for correctness check)."""
    B = x_nchw.shape[0]
    conv = jax.lax.conv_general_dilated(
        x_nchw.astype(jnp.float32), conv_w.astype(jnp.float32),
        window_strides=(PATCH_SIZE, PATCH_SIZE), padding="VALID",
        dimension_numbers=("NCHW", "OIHW", "NCHW"))           # (B, E, H/P, W/P)
    conv = conv + conv_b.reshape(1, EMBED_DIM, 1, 1)
    tok = conv.reshape(B, EMBED_DIM, NUM_PATCHES).transpose(0, 2, 1)  # (B, N, E)
    cls = jnp.broadcast_to(cls_token.reshape(1, 1, EMBED_DIM),
                           (B, 1, EMBED_DIM))
    out = jnp.concatenate([cls, tok], axis=1) + pos_emb
    return out


if __name__ == "__main__":
    key = jax.random.PRNGKey(0)
    k_x, k_w, k_b, k_cls, k_pos = jax.random.split(key, 5)

    # deterministic synthetic parameters (shapes from nn.Conv2d / nn.Parameter)
    conv_w = jax.random.normal(
        k_w, (EMBED_DIM, IN_CHANNELS, PATCH_SIZE, PATCH_SIZE), jnp.float32) * 0.1
    conv_b = jax.random.normal(k_b, (EMBED_DIM,), jnp.float32) * 0.1
    cls_token = jax.random.normal(k_cls, (1, IN_CHANNELS, EMBED_DIM), jnp.float32)
    pos_emb = jax.random.normal(k_pos, (1, NUM_PATCHES + 1, EMBED_DIM), jnp.float32)

    # B=2 exercises the tiny-batch full-extent block (grid=1);
    # B=128 exercises the tiled, multi-step path (grid>=2, lane-packed blocks).
    for B in (2, 128):
        x = jax.random.normal(jax.random.fold_in(k_x, B),
                              (B, IN_CHANNELS, IMG_SIZE, IMG_SIZE), jnp.float32)
        out = jax.block_until_ready(patch_embedding(x, conv_w, conv_b, cls_token, pos_emb))
        ref = jax.block_until_ready(_reference(x, conv_w, conv_b, cls_token, pos_emb))
        np.testing.assert_allclose(np.asarray(out), np.asarray(ref),
                                   rtol=1e-5, atol=1e-5)
        assert out.shape == (B, NUM_PATCHES + 1, EMBED_DIM)

    print("KERNEL_OK")
</pallas_src>

<mosaic_0001>
module attributes {stable_mosaic.version = 11 : i64} {
  func.func @_patch_embed_kernel(%arg0: i32, %arg1: memref<25x128xf32, #tpu.memory_space<vmem>>, %arg2: memref<128x128xf32, #tpu.memory_space<vmem>>, %arg3: memref<25x128xf32, #tpu.memory_space<vmem>>, %arg4: memref<25x128xf32, #tpu.memory_space<vmem>>) attributes {dimension_semantics = [#tpu.dimension_semantics<parallel>], iteration_bounds = array<i64: 1>, scalar_prefetch = 0 : i64, scratch_operands = 0 : i64, tpu.core_type = #tpu.core_type<tc>, window_params = [{transform_indices = @transform_0, window_bounds = array<i64: 25, 128>}, {pipeline_mode = #tpu.pipeline_mode<synchronous>, transform_indices = @transform_1, window_bounds = array<i64: 128, 128>}, {pipeline_mode = #tpu.pipeline_mode<synchronous>, transform_indices = @transform_2, window_bounds = array<i64: 25, 128>}, {transform_indices = @transform_3, window_bounds = array<i64: 25, 128>}]} {
    %c0 = arith.constant 0 : index
    %c0_0 = arith.constant 0 : index
    %0 = vector.load %arg1[%c0, %c0_0] : memref<25x128xf32, #tpu.memory_space<vmem>>, vector<25x128xf32>
    %c0_1 = arith.constant 0 : index
    %c0_2 = arith.constant 0 : index
    %1 = vector.load %arg2[%c0_1, %c0_2] : memref<128x128xf32, #tpu.memory_space<vmem>>, vector<128x128xf32>
    %cst = arith.constant dense<0.000000e+00> : vector<25x128xf32>
    %2 = tpu.matmul %0, %1, %cst {dimension_numbers = #tpu.dot_dimension_numbers<[1], [0], [0], [1], [0, 0, 1, 1], [], []>} : vector<25x128xf32>, vector<128x128xf32>, vector<25x128xf32> -> vector<25x128xf32>
    %c0_3 = arith.constant 0 : index
    %c0_4 = arith.constant 0 : index
    %3 = vector.load %arg3[%c0_3, %c0_4] : memref<25x128xf32, #tpu.memory_space<vmem>>, vector<25x128xf32>
    %4 = arith.addf %2, %3 : vector<25x128xf32>
    %c0_5 = arith.constant 0 : index
    %c0_6 = arith.constant 0 : index
    %5 = vector.load %arg4[%c0_5, %c0_6] : memref<25x128xf32, #tpu.memory_space<vmem>>, vector<25x128xf32>
    tpu.vector_store %arg4[%c0_5, %c0_6], %4 {strides = array<i32>} : memref<25x128xf32, #tpu.memory_space<vmem>>, vector<25x128xf32>,
    return
  }
  func.func @transform_0(%arg0: i32) -> (i32, i32) {
    %c0_i32 = arith.constant 0 : i32
    %c0_i32_0 = arith.constant 0 : i32
    return %arg0, %c0_i32 : i32, i32
  }
  func.func @transform_1(%arg0: i32) -> (i32, i32) {
    %c0_i32 = arith.constant 0 : i32
    %c0_i32_0 = arith.constant 0 : i32
    %c0_i32_1 = arith.constant 0 : i32
    return %c0_i32, %c0_i32_0 : i32, i32
  }
  func.func @transform_2(%arg0: i32) -> (i32, i32) {
    %c0_i32 = arith.constant 0 : i32
    %c0_i32_0 = arith.constant 0 : i32
    %c0_i32_1 = arith.constant 0 : i32
    return %c0_i32, %c0_i32_0 : i32, i32
  }
  func.func @transform_3(%arg0: i32) -> (i32, i32) {
    %c0_i32 = arith.constant 0 : i32
    %c0_i32_0 = arith.constant 0 : i32
    return %arg0, %c0_i32 : i32, i32
  }
}

</mosaic_0001>

<bundles_post_ra>
// kernel: tile.8
= control target key start
LH: loop header
LB: loop body
LE: loop exit
PB: predicated region body
PF: predicated region fallthrough
CT: control target
= control target key end

     0   :  { %s220_s0 = inlined_call_operand.vmem [shape: f32[50,16], index: 0, kind: input, shape index: {}]   ;;  %s221_s1 = inlined_call_operand.vmem [shape: f32[4,50,1,16], index: 1, kind: output, shape index: {}]  }
   0x1   :  { %v4_v0 = vld [vmem:[%s220_s0] sm:$0xff]  ;;  %v75_v1 = vld [vmem:[%s220_s0 + $0x8] sm:$0xff]  ;;  %v80_v2 = vld [vmem:[%s220_s0 + $0x10] sm:$0xff] }
   0x2   :  { %5 = vst [vmem:[%s221_s1] sm:$0xff] %v4_v0  ;;  %v85_v3 = vld [vmem:[%s220_s0 + $0x18] sm:$0xff]  ;;  %v90_v4 = vld [vmem:[%s220_s0 + $0x20] sm:$0xff]  ;;  %v95_v5 = vld [vmem:[%s220_s0 + $0x28] sm:$0xff] }
   0x3   :  { %72 = vst [vmem:[%s221_s1 + $0x38] sm:$0xff] %v4_v0  ;;  %v100_v6 = vld [vmem:[%s220_s0 + $0x30] sm:$0xff] }
   0x4   :  { %73 = vst [vmem:[%s221_s1 + $0x70] sm:$0xff] %v4_v0 }
   0x5   :  { %74 = vst [vmem:[%s221_s1 + $0xa8] sm:$0xff] %v4_v0 }
   0x6   :  { %76 = vst [vmem:[%s221_s1 + $0x8] sm:$0xff] %v75_v1 }
   0x7   :  { %77 = vst [vmem:[%s221_s1 + $0x40] sm:$0xff] %v75_v1 }
   0x8   :  { %78 = vst [vmem:[%s221_s1 + $0x78] sm:$0xff] %v75_v1 }
   0x9   :  { %79 = vst [vmem:[%s221_s1 + $0xb0] sm:$0xff] %v75_v1 }
   0xa   :  { %81 = vst [vmem:[%s221_s1 + $0x10] sm:$0xff] %v80_v2 }
   0xb   :  { %82 = vst [vmem:[%s221_s1 + $0x48] sm:$0xff] %v80_v2 }
   0xc   :  { %83 = vst [vmem:[%s221_s1 + $0x80] sm:$0xff] %v80_v2 }
   0xd   :  { %84 = vst [vmem:[%s221_s1 + $0xb8] sm:$0xff] %v80_v2 }
   0xe   :  { %86 = vst [vmem:[%s221_s1 + $0x18] sm:$0xff] %v85_v3 }
   0xf   :  { %87 = vst [vmem:[%s221_s1 + $0x50] sm:$0xff] %v85_v3 }
  0x10   :  { %88 = vst [vmem:[%s221_s1 + $0x88] sm:$0xff] %v85_v3 }
  0x11   :  { %89 = vst [vmem:[%s221_s1 + $0xc0] sm:$0xff] %v85_v3 }
  0x12   :  { %91 = vst [vmem:[%s221_s1 + $0x20] sm:$0xff] %v90_v4 }
  0x13   :  { %92 = vst [vmem:[%s221_s1 + $0x58] sm:$0xff] %v90_v4 }
  0x14   :  { %93 = vst [vmem:[%s221_s1 + $0x90] sm:$0xff] %v90_v4 }
  0x15   :  { %94 = vst [vmem:[%s221_s1 + $0xc8] sm:$0xff] %v90_v4 }
  0x16   :  { %96 = vst [vmem:[%s221_s1 + $0x28] sm:$0xff] %v95_v5 }
  0x17   :  { %97 = vst [vmem:[%s221_s1 + $0x60] sm:$0xff] %v95_v5 }
  0x18   :  { %98 = vst [vmem:[%s221_s1 + $0x98] sm:$0xff] %v95_v5 }
  0x19   :  { %99 = vst [vmem:[%s221_s1 + $0xd0] sm:$0xff] %v95_v5 }
  0x1a   :  { %101 = vst [vmem:[%s221_s1 + $0x30] sm:$0xff] %v100_v6 }
  0x1b   :  { %102 = vst [vmem:[%s221_s1 + $0x68] sm:$0xff] %v100_v6 }
  0x1c   :  { %103 = vst [vmem:[%s221_s1 + $0xa0] sm:$0xff] %v100_v6 }
  0x1d   :  { %104 = vst [vmem:[%s221_s1 + $0xd8] sm:$0xff] %v100_v6 }

// kernel: tile.9
= control target key start
LH: loop header
LB: loop body
LE: loop exit
PB: predicated region body
PF: predicated region fallthrough
CT: control target
= control target key end

     0   :  { %vm13_vm0 = vcmask 1045508   ;;  %s41_s6 = smov 48  ;;  %s46_s7 = smov 192  ;;  %vm48_vm1 = vcmask 1047558   ;;  %vm70_vm2 = vcmask 1045506   ;;  %vm58_vm3 = vcmask 1047556   ;;  %s893_s0 = inlined_call_operand.vmem [shape: f32[4,50,1,16], index: 0, kind: input, shape index: {}]   ;;  %s894_s1 = inlined_call_operand.vmem [shape: f32[25,128], index: 1, kind: output, shape index: {}]  }
   0x1   :  { %v410_v0 = vld [vmem:[%s893_s0 + $0x7] ss:$8 sm:$0xf]   ;;  %v412_v3 = vld [vmem:[%s893_s0 + $0xd] ss:$8 sm:%s46_s7]   ;;  %s66_s14 = smov 3 }
   0x2   :  { %v411_v1 = vld [vmem:[%s893_s0 + $0x7] ss:$8 sm:%s41_s6]   ;;  %v417_v4 = vld [vmem:[%s893_s0 + $0x99] ss:$8 sm:$0x3c]   ;;  %s73_s19 = smov 192 }
   0x3   :  { %v44_v2 = vsel %vm13_vm0, %v411_v1, %v410_v0  ;;  %v416_v6 = vld [vmem:[%s893_s0 + $0x93] ss:$8 sm:%s66_s14]   ;;  %s504_s20 = smov 112   ;;  %v418_v8 = vld [vmem:[%s893_s0 + $0x99] ss:$8 sm:%s73_s19]   ;;  %s92_s27 = smov 48 }
   0x4   :  { %v49_v5 = vsel %vm48_vm1, %v412_v3, %v44_v2  ;;  %v71_v7 = vsel %vm70_vm2, %v417_v4, %v416_v6  ;;  %v413_v10 = vld [vmem:[%s893_s0 + $0x4d] ss:$8 sm:$0xf]   ;;  %v414_v11 = vld [vmem:[%s893_s0 + $0x53] ss:$8 sm:$0xf0]  }
   0x5   :  { %50 = vrot.lane.b32.xlu0 %v49_v5, %s504_s20  ;;  %v76_v9 = vsel %vm48_vm1, %v418_v8, %v71_v7  ;;  %s117_s28 = smov 3  ;;  %v422_v12 = vld [vmem:[%s893_s0 + $0x6] ss:$8 sm:$0xf]   ;;  %v59_v13 = vsel %vm58_vm3, %v414_v11, %v413_v10  ;;  %s97_s4 = smov 192  ;;  %vm171_vm4 = vcmask 1046531  }
   0x6   :  { %77 = vrot.lane.b32.xlu1 %v76_v9, %s504_s20  ;;  %v423_v14 = vld [vmem:[%s893_s0 + $0x6] ss:$8 sm:%s92_s27]   ;;  %v420_v15 = vld [vmem:[%s893_s0 + $0xd9] sm:$0x1]   ;;  %s124_s7 = smov 192  ;;  %s505_s14 = smov 96  }
   0x7   :  { %v95_v16 = vsel %vm13_vm0, %v423_v14, %v422_v12  ;;  %v424_v17 = vld [vmem:[%s893_s0 + $0xc] ss:$8 sm:%s97_s4]   ;;  %v428_v18 = vld [vmem:[%s893_s0 + $0x92] ss:$8 sm:%s117_s28]   ;;  %s143_s21 = smov 48  ;;  %s148_s28 = smov 192 }
   0x8   :  { %v429_v19 = vld [vmem:[%s893_s0 + $0x98] ss:$8 sm:$0x3c]   ;;  %v100_v20 = vsel %vm48_vm1, %v424_v17, %v95_v16  ;;  %v425_v23 = vld [vmem:[%s893_s0 + $0x4c] ss:$8 sm:$0xf]  }
   0x9   :  { %101 = vrot.lane.b32.xlu2 %v100_v20, %s505_s14  ;;  %v430_v21 = vld [vmem:[%s893_s0 + $0x98] ss:$8 sm:%s124_s7]   ;;  %v122_v22 = vsel %vm70_vm2, %v429_v19, %v428_v18  ;;  %v426_v24 = vld [vmem:[%s893_s0 + $0x52] ss:$8 sm:$0xf0]   ;;  %vm175_vm5 = vcmask 1047559  }
   0xa   :  { %v127_v25 = vsel %vm48_vm1, %v430_v21, %v122_v22  ;;  %v110_v26 = vsel %vm58_vm3, %v426_v24, %v425_v23  ;;  %v432_v27 = vld [vmem:[%s893_s0 + $0xd8] sm:$0x1]   ;;  %v434_v28 = vld [vmem:[%s893_s0 + $0x5] ss:$8 sm:$0xf]   ;;  %s192_s12 = smov 48 }
   0xb   :  { %v435_v29 = vld [vmem:[%s893_s0 + $0x5] ss:$8 sm:%s143_s21]   ;;  %v437_v30 = vld [vmem:[%s893_s0 + $0x4b] ss:$8 sm:$0xf]   ;;  %s197_s17 = smov 192 }
   0xc   :  { %v440_v31 = vld [vmem:[%s893_s0 + $0x91] ss:$8 sm:$0x7]   ;;  %v441_v32 = vld [vmem:[%s893_s0 + $0x97] ss:$8 sm:$0x78]   ;;  %v146_v34 = vsel %vm13_vm0, %v435_v29, %v434_v28 }
   0xd   :  { %60 = vrot.lane.b32.xlu0 %v59_v13, %s504_s20  ;;  %v438_v33 = vld [vmem:[%s893_s0 + $0x51] ss:$8 sm:$0xf0]   ;;  %v436_v35 = vld [vmem:[%s893_s0 + $0xb] ss:$8 sm:%s148_s28]   ;;  %v172_v36 = vsel %vm171_vm4, %v441_v32, %v440_v31  ;;  %s506_s18 = smov 80  }
   0xe   :  { %84 = vrot.lane.b32.xlu1 %v420_v15, %s504_s20  ;;  %v442_v37 = vld [vmem:[%s893_s0 + $0xc8] sm:$0x80]   ;;  %v161_v38 = vsel %vm58_vm3, %v438_v33, %v437_v30  ;;  %v151_v39 = vsel %vm48_vm1, %v436_v35, %v146_v34  ;;  %v446_v41 = vld [vmem:[%s893_s0 + $0x4] ss:$8 sm:$0xf]   ;;  %s241_s27 = smov 48 }
   0xf   :  { %v176_v40 = vsel %vm175_vm5, %v442_v37, %v172_v36  ;;  %v447_v42 = vld [vmem:[%s893_s0 + $0x4] ss:$8 sm:%s192_s12]   ;;  %v448_v44 = vld [vmem:[%s893_s0 + $0xa] ss:$8 sm:%s197_s17]   ;;  %vm4_vm6 = vcmask 1046532   ;;  %vm6_vm7 = vcmask 130048  }
  0x10   :  { %v195_v43 = vsel %vm13_vm0, %v447_v42, %v446_v41  ;;  %v449_v45 = vld [vmem:[%s893_s0 + $0x4a] ss:$8 sm:$0xf]   ;;  %v450_v46 = vld [vmem:[%s893_s0 + $0x50] ss:$8 sm:$0xf0]  }
  0x11   :  { %111 = vrot.lane.b32.xlu2 %v110_v26, %s505_s14  ;;  %v200_v47 = vsel %vm48_vm1, %v448_v44, %v195_v43  ;;  %v444_v48 = vld [vmem:[%s893_s0 + $0xd7] sm:$0x1]   ;;  %v452_v49 = vld [vmem:[%s893_s0 + $0x90] ss:$8 sm:$0x7]   ;;  %v210_v50 = vsel %vm58_vm3, %v450_v46, %v449_v45  ;;  %s365_s5 = smov 48 }
  0x12   :  { %v458_v51 = vld [vmem:[%s893_s0 + $0x3] ss:$8 sm:$0xf]   ;;  %v453_v52 = vld [vmem:[%s893_s0 + $0x96] ss:$8 sm:$0x78]  }
  0x13   :  { %s507_s6 = smov 64   ;;  %v2_v53 = vld [vmem:[%s893_s0] ss:$8 sm:$0xf]   ;;  %v459_v55 = vld [vmem:[%s893_s0 + $0x3] ss:$8 sm:%s241_s27]   ;;  %v221_v57 = vsel %vm171_vm4, %v453_v52, %v452_v49 }
  0x14   :  { %v3_v54 = vld [vmem:[%s893_s0] ss:$8 sm:$0x70]   ;;  %s246_s13 = smov 192  ;;  %v454_v58 = vld [vmem:[%s893_s0 + $0xc7] sm:$0x80]   ;;  %v244_v61 = vsel %vm13_vm0, %v459_v55, %v458_v51 }
  0x15   :  { %128 = vrot.lane.b32.xlu0 %v127_v25, %s505_s14  ;;  %v5_v56 = vsel %vm4_vm6, %v3_v54, %v2_v53  ;;  %v487_v59 = vld [vmem:[%s893_s0 + $0x47] ss:$8 sm:$0xf]   ;;  %v460_v62 = vld [vmem:[%s893_s0 + $0x9] ss:$8 sm:%s246_s13]   ;;  %s257_s25 = smov 48  ;;  %v225_v2 = vsel %vm175_vm5, %v454_v58, %v221_v57 }
  0x16   :  { %135 = vrot.lane.b32.xlu1 %v432_v27, %s505_s14  ;;  %s370_s14 = smov 192  ;;  %7 = vst.msk [vmem:[%s894_s1] sm:$0x7f] %vm6_vm7, %v5_v56   ;;  %v488_v60 = vld [vmem:[%s893_s0 + $0x2f] ss:$14 sm:%s365_s5]   ;;  %v249_v6 = vsel %vm48_vm1, %v460_v62, %v244_v61  ;;  %s262_s10 = smov 192 }
  0x17   :  { %v368_v63 = vsel %vm13_vm0, %v488_v60, %v487_v59  ;;  %v489_v0 = vld [vmem:[%s893_s0 + $0x4d] ss:$8 sm:%s370_s14]   ;;  %v456_v1 = vld [vmem:[%s893_s0 + $0xd6] sm:$0x1]   ;;  %s312_s15 = smov 48  ;;  %s296_s16 = smov 48 }
  0x18   :  { %v373_v3 = vsel %vm48_vm1, %v489_v0, %v368_v63  ;;  %v465_v4 = vld [vmem:[%s893_s0 + $0x8f] ss:$8 sm:$0x7]   ;;  %v466_v5 = vld [vmem:[%s893_s0 + $0x95] ss:$8 sm:$0x78]  }
  0x19   :  { %152 = vrot.lane.b32.xlu2 %v151_v39, %s506_s18  ;;  %v461_v7 = vld [vmem:[%s893_s0 + $0x49] ss:$8 sm:$0xf]   ;;  %v276_v9 = vsel %vm171_vm4, %v466_v5, %v465_v4  ;;  %v467_v10 = vld [vmem:[%s893_s0 + $0xc6] sm:$0x80]   ;;  %s317_s19 = smov 192 }
  0x1a   :  { %v462_v8 = vld [vmem:[%s893_s0 + $0x31] ss:$14 sm:%s257_s25]   ;;  %v280_v13 = vsel %vm175_vm5, %v467_v10, %v276_v9  ;;  %v469_v14 = vld [vmem:[%s893_s0 + $0xd5] sm:$0x1]   ;;  %s301_s28 = smov 192  ;;  %s509_s14 = smov 32  }
  0x1b   :  { %v260_v11 = vsel %vm13_vm0, %v462_v8, %v461_v7  ;;  %v463_v12 = vld [vmem:[%s893_s0 + $0x4f] ss:$8 sm:%s262_s10]   ;;  %v474_v16 = vld [vmem:[%s893_s0 + $0x48] ss:$8 sm:$0xf]   ;;  %s510_s23 = smov 16  }
  0x1c   :  { %v265_v15 = vsel %vm48_vm1, %v463_v12, %v260_v11  ;;  %v475_v17 = vld [vmem:[%s893_s0 + $0x30] ss:$14 sm:%s312_s15]   ;;  %v484_v31 = vld [vmem:[%s893_s0 + $0x1] ss:$8 sm:$0xf]   ;;  %s21_s4 = smov 48 }
  0x1d   :  { %162 = vrot.lane.b32.xlu0 %v161_v38, %s506_s18  ;;  %v471_v18 = vld [vmem:[%s893_s0 + $0x2] ss:$8 sm:$0xf]   ;;  %v476_v20 = vld [vmem:[%s893_s0 + $0x4e] ss:$8 sm:%s317_s19]   ;;  %v315_v23 = vsel %vm13_vm0, %v475_v17, %v474_v16  ;;  %s31_s8 = smov 48 }
  0x1e   :  { %177 = vrot.lane.b32.xlu1 %v176_v40, %s506_s18  ;;  %v472_v19 = vld [vmem:[%s893_s0 + $0x2] ss:$8 sm:%s296_s16]   ;;  %v478_v21 = vld [vmem:[%s893_s0 + $0x8e] ss:$8 sm:$0x7]   ;;  %v320_v28 = vsel %vm48_vm1, %v476_v20, %v315_v23  ;;  %vm52_vm8 = vcmask 1048448  }
  0x1f   :  { %v479_v22 = vld [vmem:[%s893_s0 + $0x94] ss:$8 sm:$0x78]   ;;  %v299_v24 = vsel %vm13_vm0, %v472_v19, %v471_v18  ;;  %v473_v25 = vld [vmem:[%s893_s0 + $0x8] ss:$8 sm:%s301_s28]   ;;  %s11_s28 = smov 48 }
  0x20   :  { %v331_v26 = vsel %vm171_vm4, %v479_v22, %v478_v21  ;;  %v480_v27 = vld [vmem:[%s893_s0 + $0xc5] sm:$0x80]   ;;  %v304_v29 = vsel %vm48_vm1, %v473_v25, %v299_v24  ;;  %v485_v32 = vld [vmem:[%s893_s0 + $0x1] ss:$8 sm:$0x70]   ;;  %vm103_vm9 = vcmask 917248  }
  0x21   :  { %184 = vrot.lane.b32.xlu2 %v444_v48, %s506_s18  ;;  %v335_v30 = vsel %vm175_vm5, %v480_v27, %v331_v26  ;;  %v353_v33 = vsel %vm4_vm6, %v485_v32, %v484_v31  ;;  %v486_v34 = vld [vmem:[%s893_s0 + $0x38] sm:$0x80]   ;;  %v482_v36 = vld [vmem:[%s893_s0 + $0xd4] sm:$0x1]   ;;  %v493_v40 = vld [vmem:[%s893_s0 + $0xc4] sm:$0x80]  }
  0x22   :  { %v357_v35 = vsel %vm175_vm5, %v486_v34, %v353_v33  ;;  %v491_v37 = vld [vmem:[%s893_s0 + $0x8d] ss:$8 sm:$0x7]   ;;  %v492_v38 = vld [vmem:[%s893_s0 + $0x93] ss:$8 sm:$0x78]  }
  0x23   :  { %v384_v39 = vsel %vm171_vm4, %v492_v38, %v491_v37  ;;  %v495_v41 = vld [vmem:[%s893_s0 + $0xd3] sm:$0x1]   ;;  %v401_v43 = vld [vmem:[%s893_s0 + $0x3e] ss:$8 sm:$0xf]   ;;  %vm154_vm10 = vcmask 786048  }
  0x24   :  { %v388_v42 = vsel %vm175_vm5, %v493_v40, %v384_v39  ;;  %v402_v44 = vld [vmem:[%s893_s0 + $0x3e] ss:$8 sm:%s11_s28]   ;;  %v404_v46 = vld [vmem:[%s893_s0 + $0x74] ss:$8 sm:$0xf]   ;;  %vm203_vm11 = vcmask 654848  }
  0x25   :  { %201 = vrot.lane.b32.xlu0 %v200_v47, %s507_s6  ;;  %v14_v45 = vsel %vm13_vm0, %v402_v44, %v401_v43  ;;  %v405_v47 = vld [vmem:[%s893_s0 + $0x74] ss:$8 sm:%s21_s4]   ;;  %v407_v49 = vld [vmem:[%s893_s0 + $0xaa] ss:$8 sm:$0xf]   ;;  %vm252_vm12 = vcmask 523648  }
  0x26   :  { %211 = vrot.lane.b32.xlu1 %v210_v50, %s507_s6  ;;  %403 = vst.msk [vmem:[%s894_s1 + $0x7] sm:$0x3f] %vm6_vm7, %v14_v45   ;;  %v24_v48 = vsel %vm13_vm0, %v405_v47, %v404_v46  ;;  %v408_v50 = vld [vmem:[%s893_s0 + $0xaa] ss:$8 sm:%s31_s8]   ;;  %vm307_vm13 = vcmask 392448   ;;  %vm360_vm14 = vcmask 261248  }
  0x27   :  { %406 = vst.msk [vmem:[%s894_s1 + $0xd] sm:$0x3f] %vm6_vm7, %v24_v48   ;;  %v34_v51 = vsel %vm13_vm0, %v408_v50, %v407_v49 }
  0x28   :  { %409 = vst.msk [vmem:[%s894_s1 + $0x13] sm:$0x3f] %vm6_vm7, %v34_v51  }
  0x29   :  { %226 = vrot.lane.b32.xlu2 %v225_v2, %s507_s6 }
  0x2d   :  { %233 = vrot.lane.b32.xlu0 %v456_v1, %s507_s6  ;;  %s508_s6 = smov 48  }
  0x2e   :  { %250 = vrot.lane.b32.xlu1 %v249_v6, %s508_s6 }
  0x31   :  { %266 = vrot.lane.b32.xlu2 %v265_v15, %s508_s6 }
  0x35   :  { %281 = vrot.lane.b32.xlu0 %v280_v13, %s508_s6 }
  0x36   :  { %288 = vrot.lane.b32.xlu1 %v469_v14, %s508_s6 }
  0x39   :  { %305 = vrot.lane.b32.xlu2 %v304_v29, %s509_s14 }
  0x3d   :  { %321 = vrot.lane.b32.xlu0 %v320_v28, %s509_s14 }
  0x3e   :  { %336 = vrot.lane.b32.xlu1 %v335_v30, %s509_s14 }
  0x41   :  { %343 = vrot.lane.b32.xlu2 %v482_v36, %s509_s14 }
  0x45   :  { %358 = vrot.lane.b32.xlu0 %v357_v35, %s510_s23 }
  0x46   :  { %374 = vrot.lane.b32.xlu1 %v373_v3, %s510_s23 }
  0x49   :  { %389 = vrot.lane.b32.xlu2 %v388_v42, %s510_s23 }
  0x4d   :  { %396 = vrot.lane.b32.xlu0 %v495_v41, %s510_s23 }
  0x63   :  { %v102_v52 = vpop.permute.xlu2 %101  }
  0x6b   :  { %v112_v53 = vpop.permute.xlu2 %111  }
  0x73   :  { %v153_v55 = vpop.permute.xlu2 %152  }
  0x77   :  { %v51_v54 = vpop.permute.xlu0 %50  }
  0x78   :  { %53 = vst.msk [vmem:[%s894_s1] sm:$0xff] %vm52_vm8, %v51_v54   ;;  %v78_v56 = vpop.permute.xlu1 %77  }
  0x79   :  { %104 = vst.msk [vmem:[%s894_s1] sm:$0xff] %vm103_vm9, %v102_v52  }
  0x7a   :  { %419 = vst.msk [vmem:[%s894_s1 + $0x10] sm:$0xff] %vm52_vm8, %v78_v56  }
  0x7b   :  { %155 = vst.msk [vmem:[%s894_s1] sm:$0xff] %vm154_vm10, %v153_v55   ;;  %v185_v58 = vpop.permute.xlu2 %184  }
  0x7f   :  { %v61_v57 = vpop.permute.xlu0 %60  }
  0x80   :  { %415 = vst.msk [vmem:[%s894_s1 + $0x8] sm:$0xff] %vm52_vm8, %v61_v57   ;;  %v85_v59 = vpop.permute.xlu1 %84  }
  0x81   :  { %427 = vst.msk [vmem:[%s894_s1 + $0x8] sm:$0xff] %vm103_vm9, %v112_v53  }
  0x82   :  { %421 = vst.msk [vmem:[%s894_s1 + $0x18] sm:$0x1] %vm52_vm8, %v85_v59  }
  0x83   :  { %v227_v61 = vpop.permute.xlu2 %226  }
  0x87   :  { %v129_v60 = vpop.permute.xlu0 %128  }
  0x88   :  { %431 = vst.msk [vmem:[%s894_s1 + $0x10] sm:$0xff] %vm103_vm9, %v129_v60   ;;  %v136_v62 = vpop.permute.xlu1 %135  }
  0x89   :  { %433 = vst.msk [vmem:[%s894_s1 + $0x18] sm:$0x1] %vm103_vm9, %v136_v62  }
  0x8a   :  { %445 = vst.msk [vmem:[%s894_s1 + $0x18] sm:$0x1] %vm154_vm10, %v185_v58  }
  0x8b   :  { %v267_v0 = vpop.permute.xlu2 %266  }
  0x8f   :  { %v163_v63 = vpop.permute.xlu0 %162  }
  0x90   :  { %439 = vst.msk [vmem:[%s894_s1 + $0x8] sm:$0xff] %vm154_vm10, %v163_v63   ;;  %v178_v1 = vpop.permute.xlu1 %177  }
  0x91   :  { %443 = vst.msk [vmem:[%s894_s1 + $0x10] sm:$0xff] %vm154_vm10, %v178_v1  }
  0x92   :  { %455 = vst.msk [vmem:[%s894_s1 + $0x10] sm:$0xff] %vm203_vm11, %v227_v61  }
  0x93   :  { %v306_v3 = vpop.permute.xlu2 %305  }
  0x97   :  { %v202_v2 = vpop.permute.xlu0 %201  }
  0x98   :  { %204 = vst.msk [vmem:[%s894_s1] sm:$0xff] %vm203_vm11, %v202_v2   ;;  %v212_v4 = vpop.permute.xlu1 %211  }
  0x99   :  { %451 = vst.msk [vmem:[%s894_s1 + $0x8] sm:$0xff] %vm203_vm11, %v212_v4  }
  0x9a   :  { %464 = vst.msk [vmem:[%s894_s1 + $0x8] sm:$0xff] %vm252_vm12, %v267_v0  }
  0x9b   :  { %v344_v6 = vpop.permute.xlu2 %343  }
  0x9f   :  { %v234_v5 = vpop.permute.xlu0 %233  }
  0xa0   :  { %457 = vst.msk [vmem:[%s894_s1 + $0x18] sm:$0x1] %vm203_vm11, %v234_v5   ;;  %v251_v7 = vpop.permute.xlu1 %250  }
  0xa1   :  { %253 = vst.msk [vmem:[%s894_s1] sm:$0xff] %vm252_vm12, %v251_v7  }
  0xa2   :  { %308 = vst.msk [vmem:[%s894_s1] sm:$0xff] %vm307_vm13, %v306_v3  }
  0xa3   :  { %v390_v9 = vpop.permute.xlu2 %389  }
  0xa7   :  { %v282_v8 = vpop.permute.xlu0 %281  }
  0xa8   :  { %468 = vst.msk [vmem:[%s894_s1 + $0x10] sm:$0xff] %vm252_vm12, %v282_v8   ;;  %v289_v10 = vpop.permute.xlu1 %288  }
  0xa9   :  { %470 = vst.msk [vmem:[%s894_s1 + $0x18] sm:$0x1] %vm252_vm12, %v289_v10  }
  0xaa   :  { %483 = vst.msk [vmem:[%s894_s1 + $0x18] sm:$0x1] %vm307_vm13, %v344_v6  }
  0xaf   :  { %v322_v11 = vpop.permute.xlu0 %321  }
  0xb0   :  { %477 = vst.msk [vmem:[%s894_s1 + $0x8] sm:$0xff] %vm307_vm13, %v322_v11   ;;  %v337_v12 = vpop.permute.xlu1 %336  }
  0xb1   :  { %481 = vst.msk [vmem:[%s894_s1 + $0x10] sm:$0xff] %vm307_vm13, %v337_v12  }
  0xb2   :  { %494 = vst.msk [vmem:[%s894_s1 + $0x10] sm:$0xff] %vm360_vm14, %v390_v9  }
  0xb7   :  { %v359_v13 = vpop.permute.xlu0 %358  }
  0xb8   :  { %361 = vst.msk [vmem:[%s894_s1] sm:$0xff] %vm360_vm14, %v359_v13   ;;  %v375_v14 = vpop.permute.xlu1 %374  }
  0xb9   :  { %490 = vst.msk [vmem:[%s894_s1 + $0x8] sm:$0xff] %vm360_vm14, %v375_v14  }
  0xbf   :  { %v397_v15 = vpop.permute.xlu0 %396  }
  0xc0   :  { %496 = vst.msk [vmem:[%s894_s1 + $0x18] sm:$0x1] %vm360_vm14, %v397_v15  }

// kernel: _patch_embedding_impl.1
= control target key start
LH: loop header
LB: loop body
LE: loop exit
PB: predicated region body
PF: predicated region fallthrough
CT: control target
= control target key end

     0   :  { %s227_s1 = inlined_call_operand.vmem [shape: f32[128,128], index: 1, kind: input, shape index: {}]   ;;  %s228_s0 = inlined_call_operand.vmem [shape: f32[25,128], index: 0, kind: input, shape index: {}]   ;;  %s229_s2 = inlined_call_operand.vmem [shape: f32[25,128], index: 2, kind: input, shape index: {}]   ;;  %s230_s3 = inlined_call_operand.vmem [shape: f32[25,128], index: 3, kind: output, shape index: {}]  }
   0x1   :  { %v33_v0 = vld [vmem:[%s227_s1 + $0x78] sm:$0xff]  ;;  %v32_v1 = vld [vmem:[%s227_s1 + $0x70] sm:$0xff]  ;;  %v31_v2 = vld [vmem:[%s227_s1 + $0x68] sm:$0xff] }
   0x2   :  { %76 = vmatpush.msra.mxu2 %v33_v0  ;;  %77 = vmatpush.msra.mxu3 %v33_v0  ;;  %v30_v3 = vld [vmem:[%s227_s1 + $0x60] sm:$0xff]  ;;  %v29_v4 = vld [vmem:[%s227_s1 + $0x58] sm:$0xff]  ;;  %v28_v5 = vld [vmem:[%s227_s1 + $0x50] sm:$0xff] }
   0x3   :  { %38 = vmatpush.msra.mxu0 %v33_v0  ;;  %75 = vmatpush.msra.mxu1 %v33_v0  ;;  %v27_v6 = vld [vmem:[%s227_s1 + $0x48] sm:$0xff]  ;;  %v26_v7 = vld [vmem:[%s227_s1 + $0x40] sm:$0xff]  ;;  %v25_v8 = vld [vmem:[%s227_s1 + $0x38] sm:$0xff] }
   0x4   :  { %79 = vmatpush.msra.mxu2 %v32_v1  ;;  %80 = vmatpush.msra.mxu3 %v32_v1  ;;  %v24_v9 = vld [vmem:[%s227_s1 + $0x30] sm:$0xff]  ;;  %v23_v10 = vld [vmem:[%s227_s1 + $0x28] sm:$0xff]  ;;  %v22_v11 = vld [vmem:[%s227_s1 + $0x20] sm:$0xff] }
   0x5   :  { %39 = vmatpush.msra.mxu0 %v32_v1  ;;  %78 = vmatpush.msra.mxu1 %v32_v1  ;;  %v21_v12 = vld [vmem:[%s227_s1 + $0x18] sm:$0xff]  ;;  %v20_v13 = vld [vmem:[%s227_s1 + $0x10] sm:$0xff]  ;;  %v19_v14 = vld [vmem:[%s227_s1 + $0x8] sm:$0xff] }
   0x6   :  { %82 = vmatpush.msra.mxu2 %v31_v2  ;;  %83 = vmatpush.msra.mxu3 %v31_v2  ;;  %v18_v15 = vld [vmem:[%s227_s1] sm:$0xff]  ;;  %v16_v16 = vld [vmem:[%s228_s0 + $0x10] sm:$0xff]  ;;  %v17_v17 = vld [vmem:[%s228_s0 + $0x18] sm:$0x1] }
   0x7   :  { %40 = vmatpush.msra.mxu0 %v31_v2  ;;  %81 = vmatpush.msra.mxu1 %v31_v2  ;;  %v14_v18 = vld [vmem:[%s228_s0] sm:$0xff]  ;;  %v15_v19 = vld [vmem:[%s228_s0 + $0x8] sm:$0xff]  ;;  %v36_v26 = vld [vmem:[%s229_s2 + $0x10] sm:$0xff] }
   0x8   :  { %85 = vmatpush.msra.mxu2 %v30_v3  ;;  %86 = vmatpush.msra.mxu3 %v30_v3  ;;  %v34_v20 = vld [vmem:[%s229_s2] sm:$0xff]  ;;  %v35_v21 = vld [vmem:[%s229_s2 + $0x8] sm:$0xff]  ;;  %v37_v27 = vld [vmem:[%s229_s2 + $0x18] sm:$0x1] }
   0x9   :  { %41 = vmatpush.msra.mxu0 %v30_v3  ;;  %84 = vmatpush.msra.mxu1 %v30_v3 }
   0xa   :  { %88 = vmatpush.msra.mxu2 %v29_v4  ;;  %89 = vmatpush.msra.mxu3 %v29_v4 }
   0xb   :  { %42 = vmatpush.msra.mxu0 %v29_v4  ;;  %87 = vmatpush.msra.mxu1 %v29_v4 }
   0xc   :  { %91 = vmatpush.msra.mxu2 %v28_v5  ;;  %92 = vmatpush.msra.mxu3 %v28_v5 }
   0xd   :  { %43 = vmatpush.msra.mxu0 %v28_v5  ;;  %90 = vmatpush.msra.mxu1 %v28_v5 }
   0xe   :  { %94 = vmatpush.msra.mxu2 %v27_v6  ;;  %95 = vmatpush.msra.mxu3 %v27_v6 }
   0xf   :  { %44 = vmatpush.msra.mxu0 %v27_v6  ;;  %93 = vmatpush.msra.mxu1 %v27_v6 }
  0x10   :  { %97 = vmatpush.msra.mxu2 %v26_v7  ;;  %98 = vmatpush.msra.mxu3 %v26_v7 }
  0x11   :  { %45 = vmatpush.msra.mxu0 %v26_v7  ;;  %96 = vmatpush.msra.mxu1 %v26_v7 }
  0x12   :  { %100 = vmatpush.msra.mxu2 %v25_v8  ;;  %101 = vmatpush.msra.mxu3 %v25_v8 }
  0x13   :  { %46 = vmatpush.msra.mxu0 %v25_v8  ;;  %99 = vmatpush.msra.mxu1 %v25_v8 }
  0x14   :  { %103 = vmatpush.msra.mxu2 %v24_v9  ;;  %104 = vmatpush.msra.mxu3 %v24_v9 }
  0x15   :  { %47 = vmatpush.msra.mxu0 %v24_v9  ;;  %102 = vmatpush.msra.mxu1 %v24_v9 }
  0x16   :  { %106 = vmatpush.msra.mxu2 %v23_v10  ;;  %107 = vmatpush.msra.mxu3 %v23_v10 }
  0x17   :  { %48 = vmatpush.msra.mxu0 %v23_v10  ;;  %105 = vmatpush.msra.mxu1 %v23_v10 }
  0x18   :  { %109 = vmatpush.msra.mxu2 %v22_v11  ;;  %110 = vmatpush.msra.mxu3 %v22_v11 }
  0x19   :  { %49 = vmatpush.msra.mxu0 %v22_v11  ;;  %108 = vmatpush.msra.mxu1 %v22_v11 }
  0x1a   :  { %112 = vmatpush.msra.mxu2 %v21_v12  ;;  %113 = vmatpush.msra.mxu3 %v21_v12 }
  0x1b   :  { %50 = vmatpush.msra.mxu0 %v21_v12  ;;  %111 = vmatpush.msra.mxu1 %v21_v12 }
  0x1c   :  { %115 = vmatpush.msra.mxu2 %v20_v13  ;;  %116 = vmatpush.msra.mxu3 %v20_v13 }
  0x1d   :  { %51 = vmatpush.msra.mxu0 %v20_v13  ;;  %114 = vmatpush.msra.mxu1 %v20_v13 }
  0x1e   :  { %118 = vmatpush.msra.mxu2 %v19_v14  ;;  %119 = vmatpush.msra.mxu3 %v19_v14 }
  0x1f   :  { %52 = vmatpush.msra.mxu0 %v19_v14  ;;  %117 = vmatpush.msra.mxu1 %v19_v14 }
  0x20   :  { %121 = vmatpush.msra.mxu2 %v18_v15  ;;  %122 = vmatpush.msra.mxu3 %v18_v15 }
  0x21   :  { %60 = vmatmul.f32.vlgmr.msra.gmra.mxu2 %v16_v16  ;;  %63 = vmatmul.f32.vlgmr.msra.gmra.mxu3 %v17_v17 }
  0x22   :  { %53 = vmatpush.msra.mxu0 %v18_v15  ;;  %120 = vmatpush.msra.mxu1 %v18_v15 }
  0x23   :  { %54 = vmatmul.f32.vlgmr.msra.gmra.mxu0 %v14_v18  ;;  %57 = vmatmul.f32.vlgmr.msra.gmra.mxu1 %v15_v19 }
  0xa0   :  { %v55_v22 = vpop.f32.mrf.mxu0  ;;  %v58_v23 = vpop.f32.mrf.mxu1 }
  0xa1   :  { %v56_v24 = vadd.f32 %v55_v22, %v34_v20  ;;  %v59_v25 = vadd.f32 %v58_v23, %v35_v21 }
  0xa3   :  { %67 = vst [vmem:[%s230_s3] sm:$0xff] %v56_v24 }
  0xa4   :  { %68 = vst [vmem:[%s230_s3 + $0x8] sm:$0xff] %v59_v25  ;;  %v61_v28 = vpop.f32.mrf.mxu2  ;;  %v64_v29 = vpop.f32.mrf.mxu3 }
  0xa5   :  { %v62_v30 = vadd.f32 %v61_v28, %v36_v26  ;;  %v65_v31 = vadd.f32 %v64_v29, %v37_v27 }
  0xa7   :  { %69 = vst [vmem:[%s230_s3 + $0x10] sm:$0xff] %v62_v30 }
  0xa8   :  { %70 = vst [vmem:[%s230_s3 + $0x18] sm:$0x1] %v65_v31 }

</bundles_post_ra>
